<compile_context>
chip_gen: v6e
topology: v6e:2x2x1
jax: 0.10.0
libtpu: 0.0.40
codegen_flags: <defaults>
</compile_context>

<pallas_src>
import functools
from math import exp

import jax
import jax.numpy as jnp
from jax.experimental import pallas as pl
from jax.experimental.pallas import tpu as pltpu

C1 = 0.01 ** 2
C2 = 0.03 ** 2


# --------------------------- Gaussian window ------------------------------ #
def _gaussian_weights_flat(window_size: int, sigma: float = 1.5):
    """Flattened 2D Gaussian window as plain Python floats (baked constants)."""
    g = [exp(-((x - window_size // 2) ** 2) / float(2 * sigma ** 2))
         for x in range(window_size)]
    s = sum(g)
    g = [v / s for v in g]
    return tuple(g[i] * g[j] for i in range(window_size) for j in range(window_size))


def gaussian_window_2d(window_size: int, sigma: float = 1.5) -> jnp.ndarray:
    """Same window as PyTorch create_window (used by the JAX reference)."""
    g = jnp.array(
        [exp(-((x - window_size // 2) ** 2) / float(2 * sigma ** 2))
         for x in range(window_size)],
        dtype=jnp.float32,
    )
    g = g / jnp.sum(g)
    return jnp.outer(g, g)


# ----------------------------- Pallas kernel ------------------------------ #
def _ssim_kernel(x1_ref, x2_ref, o_ref, *, weights, n_taps,
                 n_chunks_total, chunks_per_block, chunk_lanes):
    # x1_ref, x2_ref: [n_taps, chunks_per_block, 8, chunk_lanes] f32
    # o_ref:          [1, 1, 1] f32   (partial ssim-map sum for this block)
    blk = pl.program_id(0)

    # Chunks of this block holding real data (last block may be ragged; the
    # stale tail of the VMEM buffer is simply never visited).
    n_valid = jnp.minimum(chunks_per_block, n_chunks_total - blk * chunks_per_block)

    w0 = weights[0]

    def chunk_body(c, acc_vec):
        # ---- fused 9-tap Gaussian moments, all register-resident ---------- #
        a = x1_ref[0, c]                      # (8, chunk_lanes)
        b = x2_ref[0, c]
        wa = w0 * a
        wb = w0 * b
        mu1, mu2 = wa, wb
        s11, s22, s12 = wa * a, wb * b, wa * b
        for k in range(1, n_taps):
            w = weights[k]                    # Python float immediate
            a = x1_ref[k, c]
            b = x2_ref[k, c]
            wa = w * a
            wb = w * b
            mu1 = mu1 + wa
            mu2 = mu2 + wb
            s11 = s11 + wa * a
            s22 = s22 + wb * b
            s12 = s12 + wa * b

        # ---- SSIM epilogue for this chunk --------------------------------- #
        mu1_sq = mu1 * mu1
        mu2_sq = mu2 * mu2
        mu1_mu2 = mu1 * mu2
        sigma1_sq = s11 - mu1_sq
        sigma2_sq = s22 - mu2_sq
        sigma12 = s12 - mu1_mu2
        num = (2.0 * mu1_mu2 + C1) * (2.0 * sigma12 + C2)
        den = (mu1_sq + mu2_sq + C1) * (sigma1_sq + sigma2_sq + C2)
        ssim = num * pl.reciprocal(den, approx=False)   # divide on the EUP slot

        # Fold the (8, CL) chunk into a single-vreg accumulator with
        # vreg-aligned static slices (pure VALU adds, no XLU relayout).
        for j in range(chunk_lanes // 128):
            acc_vec = acc_vec + ssim[:, j * 128:(j + 1) * 128]
        return acc_vec

    acc0 = jnp.zeros((8, 128), jnp.float32)
    acc_vec = jax.lax.fori_loop(0, n_valid, chunk_body, acc0)

    # One small XLU reduction per grid step.
    o_ref[...] = jnp.sum(acc_vec, axis=(0, 1), keepdims=True).reshape(1, 1, 1)


# ------------------------------ Wrapper (glue) ----------------------------- #
def _cdiv(a: int, b: int) -> int:
    return -(-a // b)


@functools.partial(jax.jit,
                   static_argnames=("window_size", "stride", "tile_pixels",
                                    "chunk_lanes"))
def ssim_pallas(img1, img2, window_size: int = 3, stride: int = 3,
                tile_pixels: int = 131072, chunk_lanes: int = 512):
    """img1, img2: [B, C, H, W] float32 (NCHW, like PyTorch). Returns scalar."""
    assert img1.shape == img2.shape
    assert window_size == stride, "kernel exploits non-overlapping windows"
    assert chunk_lanes % 128 == 0
    B, C, H, W = img1.shape
    pad = window_size // 2
    OH = (H + 2 * pad - window_size) // stride + 1
    OW = (W + 2 * pad - window_size) // stride + 1
    P = B * C * OH * OW
    n_taps = window_size * window_size

    CL = chunk_lanes
    granule = 8 * CL                              # pixels per (8, CL) chunk
    NC = _cdiv(P, granule)                        # total chunks (flat pixels)
    P_pad = NC * granule                          # pad only to the granule
    CPB = max(1, min(tile_pixels // granule, NC)) # chunks per grid block
    NB = _cdiv(NC, CPB)                           # grid size (ragged last ok)

    def rearrange(x):
        # Emit the kernel layout [n_taps, NC, 8, CL]: taps lead, pixels dense
        # on (sublane, lane).
        xp = jnp.pad(x.astype(jnp.float32),
                     ((0, 0), (0, 0), (pad, pad), (pad, pad)))
        xp = xp[:, :, : OH * stride, : OW * stride]
        xr = xp.reshape(B, C, OH, stride, OW, stride)
        xr = xr.transpose(3, 5, 0, 1, 2, 4)       # [ws, ws, B, C, OH, OW]
        xr = xr.reshape(n_taps, P)
        xr = jnp.pad(xr, ((0, 0), (0, P_pad - P)))  # <= granule-1 zero pixels
        return xr.reshape(n_taps, NC, 8, CL)

    x1r = rearrange(img1)
    x2r = rearrange(img2)

    weights = _gaussian_weights_flat(window_size)  # 9 Python floats, baked in

    kernel = functools.partial(
        _ssim_kernel, weights=weights, n_taps=n_taps,
        n_chunks_total=NC, chunks_per_block=CPB, chunk_lanes=CL)

    block_bytes = n_taps * CPB * 8 * CL * 4
    vmem_limit = int(min(96 * 1024 * 1024,
                         max(32 * 1024 * 1024, 4 * block_bytes + 8 * 1024 * 1024)))

    partials = pl.pallas_call(
        kernel,
        out_shape=jax.ShapeDtypeStruct((NB, 1, 1), jnp.float32),
        grid_spec=pltpu.PrefetchScalarGridSpec(
            num_scalar_prefetch=0,
            grid=(NB,),
            in_specs=[
                pl.BlockSpec((n_taps, CPB, 8, CL), lambda i: (0, i, 0, 0)),
                pl.BlockSpec((n_taps, CPB, 8, CL), lambda i: (0, i, 0, 0)),
            ],
            out_specs=pl.BlockSpec((1, 1, 1), lambda i: (i, 0, 0)),
        ),
        compiler_params=pltpu.CompilerParams(
            dimension_semantics=("parallel",),
            vmem_limit_bytes=vmem_limit,
        ),
    )(x1r, x2r)

    # Zero-padded pixels each contribute ssim(0,0) = (C1*C2)/(C1*C2); subtract
    # that exactly-known bias (computed with the same reciprocal formulation).
    c1 = jnp.float32(C1)
    c2 = jnp.float32(C2)
    pad_unit = (c1 * c2) * (jnp.float32(1.0) / (c1 * c2))
    total = jnp.sum(partials) - jnp.float32(P_pad - P) * pad_unit
    return total / jnp.float32(P)


# --------------------------- Pure-JAX reference ---------------------------- #
def ssim_reference(img1, img2, window_size: int = 3, stride: int = 3):
    B, C, H, W = img1.shape
    w2d = gaussian_window_2d(window_size)
    w = jnp.broadcast_to(w2d, (C, 1, window_size, window_size))
    pad = window_size // 2

    def conv(x):
        return jax.lax.conv_general_dilated(
            x, w, window_strides=(stride, stride),
            padding=[(pad, pad), (pad, pad)],
            feature_group_count=C,
            dimension_numbers=("NCHW", "OIHW", "NCHW"),
        )

    img1 = img1.astype(jnp.float32)
    img2 = img2.astype(jnp.float32)
    mu1, mu2 = conv(img1), conv(img2)
    mu1_sq, mu2_sq, mu1_mu2 = mu1 * mu1, mu2 * mu2, mu1 * mu2
    s1 = conv(img1 * img1) - mu1_sq
    s2 = conv(img2 * img2) - mu2_sq
    s12 = conv(img1 * img2) - mu1_mu2
    ssim_map = ((2 * mu1_mu2 + C1) * (2 * s12 + C2)) / (
        (mu1_sq + mu2_sq + C1) * (s1 + s2 + C2)
    )
    return jnp.mean(ssim_map)


if __name__ == "__main__":
    key = jax.random.PRNGKey(0)
    k1, k2 = jax.random.split(key)
    img1 = jax.random.uniform(k1, (2, 4, 16, 16), dtype=jnp.float32)
    img2 = jax.random.uniform(k2, (2, 4, 16, 16), dtype=jnp.float32)

    out = ssim_pallas(img1, img2)
    jax.block_until_ready(out)

    ref = ssim_reference(img1, img2)
    assert jnp.allclose(out, ref, rtol=1e-4, atol=1e-5), (out, ref)

    print("KERNEL_OK")
</pallas_src>

<mosaic_0001>
module attributes {stable_mosaic.version = 11 : i64} {
  func.func @_ssim_kernel(%arg0: i32, %arg1: memref<9x1x8x512xf32, #tpu.memory_space<vmem>>, %arg2: memref<9x1x8x512xf32, #tpu.memory_space<vmem>>, %arg3: memref<1x1x1xf32, #tpu.memory_space<vmem>>) attributes {dimension_semantics = [#tpu.dimension_semantics<parallel>], iteration_bounds = array<i64: 1>, scalar_prefetch = 0 : i64, scratch_operands = 0 : i64, tpu.core_type = #tpu.core_type<tc>, window_params = [{transform_indices = @transform_0, window_bounds = array<i64: 9, 1, 8, 512>}, {transform_indices = @transform_1, window_bounds = array<i64: 9, 1, 8, 512>}, {transform_indices = @transform_2, window_bounds = array<i64: 1, 1, 1>}]} {
    %c1_i32 = arith.constant 1 : i32
    %0 = arith.muli %arg0, %c1_i32 : i32
    %c1_i32_0 = arith.constant 1 : i32
    %1 = arith.subi %c1_i32_0, %0 : i32
    %c1_i32_1 = arith.constant 1 : i32
    %2 = arith.minsi %c1_i32_1, %1 : i32
    %cst = arith.constant 0.000000e+00 : f32
    %3 = vector.broadcast %cst : f32 to vector<8x128xf32>
    %c0_i32 = arith.constant 0 : i32
    %4 = arith.subi %2, %c0_i32 : i32
    %5 = arith.addi %c0_i32, %4 : i32
    %c1_i32_2 = arith.constant 1 : i32
    %6 = scf.for %arg4 = %c0_i32 to %5 step %c1_i32_2 iter_args(%arg5 = %3) -> (vector<8x128xf32>)  : i32 {
      %c0_6 = arith.constant 0 : index
      %14 = arith.index_cast %arg4 : i32 to index
      %c0_7 = arith.constant 0 : index
      %c0_8 = arith.constant 0 : index
      %15 = vector.load %arg1[%c0_6, %14, %c0_7, %c0_8] : memref<9x1x8x512xf32, #tpu.memory_space<vmem>>, vector<1x1x8x512xf32>
      %16 = vector.shape_cast %15 : vector<1x1x8x512xf32> to vector<8x512xf32>
      %c0_9 = arith.constant 0 : index
      %17 = arith.index_cast %arg4 : i32 to index
      %c0_10 = arith.constant 0 : index
      %c0_11 = arith.constant 0 : index
      %18 = vector.load %arg2[%c0_9, %17, %c0_10, %c0_11] : memref<9x1x8x512xf32, #tpu.memory_space<vmem>>, vector<1x1x8x512xf32>
      %19 = vector.shape_cast %18 : vector<1x1x8x512xf32> to vector<8x512xf32>
      %cst_12 = arith.constant 0.0947416574 : f32
      %20 = vector.broadcast %cst_12 : f32 to vector<8x512xf32>
      %21 = arith.mulf %20, %16 : vector<8x512xf32>
      %cst_13 = arith.constant 0.0947416574 : f32
      %22 = vector.broadcast %cst_13 : f32 to vector<8x512xf32>
      %23 = arith.mulf %22, %19 : vector<8x512xf32>
      %24 = arith.mulf %21, %16 : vector<8x512xf32>
      %25 = arith.mulf %23, %19 : vector<8x512xf32>
      %26 = arith.mulf %21, %19 : vector<8x512xf32>
      %c1 = arith.constant 1 : index
      %27 = arith.index_cast %arg4 : i32 to index
      %c0_14 = arith.constant 0 : index
      %c0_15 = arith.constant 0 : index
      %28 = vector.load %arg1[%c1, %27, %c0_14, %c0_15] : memref<9x1x8x512xf32, #tpu.memory_space<vmem>>, vector<1x1x8x512xf32>
      %29 = vector.shape_cast %28 : vector<1x1x8x512xf32> to vector<8x512xf32>
      %c1_16 = arith.constant 1 : index
      %30 = arith.index_cast %arg4 : i32 to index
      %c0_17 = arith.constant 0 : index
      %c0_18 = arith.constant 0 : index
      %31 = vector.load %arg2[%c1_16, %30, %c0_17, %c0_18] : memref<9x1x8x512xf32, #tpu.memory_space<vmem>>, vector<1x1x8x512xf32>
      %32 = vector.shape_cast %31 : vector<1x1x8x512xf32> to vector<8x512xf32>
      %cst_19 = arith.constant 0.118318014 : f32
      %33 = vector.broadcast %cst_19 : f32 to vector<8x512xf32>
      %34 = arith.mulf %33, %29 : vector<8x512xf32>
      %cst_20 = arith.constant 0.118318014 : f32
      %35 = vector.broadcast %cst_20 : f32 to vector<8x512xf32>
      %36 = arith.mulf %35, %32 : vector<8x512xf32>
      %37 = arith.addf %21, %34 : vector<8x512xf32>
      %38 = arith.addf %23, %36 : vector<8x512xf32>
      %39 = arith.mulf %34, %29 : vector<8x512xf32>
      %40 = arith.addf %24, %39 : vector<8x512xf32>
      %41 = arith.mulf %36, %32 : vector<8x512xf32>
      %42 = arith.addf %25, %41 : vector<8x512xf32>
      %43 = arith.mulf %34, %32 : vector<8x512xf32>
      %44 = arith.addf %26, %43 : vector<8x512xf32>
      %c2 = arith.constant 2 : index
      %45 = arith.index_cast %arg4 : i32 to index
      %c0_21 = arith.constant 0 : index
      %c0_22 = arith.constant 0 : index
      %46 = vector.load %arg1[%c2, %45, %c0_21, %c0_22] : memref<9x1x8x512xf32, #tpu.memory_space<vmem>>, vector<1x1x8x512xf32>
      %47 = vector.shape_cast %46 : vector<1x1x8x512xf32> to vector<8x512xf32>
      %c2_23 = arith.constant 2 : index
      %48 = arith.index_cast %arg4 : i32 to index
      %c0_24 = arith.constant 0 : index
      %c0_25 = arith.constant 0 : index
      %49 = vector.load %arg2[%c2_23, %48, %c0_24, %c0_25] : memref<9x1x8x512xf32, #tpu.memory_space<vmem>>, vector<1x1x8x512xf32>
      %50 = vector.shape_cast %49 : vector<1x1x8x512xf32> to vector<8x512xf32>
      %cst_26 = arith.constant 0.0947416574 : f32
      %51 = vector.broadcast %cst_26 : f32 to vector<8x512xf32>
      %52 = arith.mulf %51, %47 : vector<8x512xf32>
      %cst_27 = arith.constant 0.0947416574 : f32
      %53 = vector.broadcast %cst_27 : f32 to vector<8x512xf32>
      %54 = arith.mulf %53, %50 : vector<8x512xf32>
      %55 = arith.addf %37, %52 : vector<8x512xf32>
      %56 = arith.addf %38, %54 : vector<8x512xf32>
      %57 = arith.mulf %52, %47 : vector<8x512xf32>
      %58 = arith.addf %40, %57 : vector<8x512xf32>
      %59 = arith.mulf %54, %50 : vector<8x512xf32>
      %60 = arith.addf %42, %59 : vector<8x512xf32>
      %61 = arith.mulf %52, %50 : vector<8x512xf32>
      %62 = arith.addf %44, %61 : vector<8x512xf32>
      %c3 = arith.constant 3 : index
      %63 = arith.index_cast %arg4 : i32 to index
      %c0_28 = arith.constant 0 : index
      %c0_29 = arith.constant 0 : index
      %64 = vector.load %arg1[%c3, %63, %c0_28, %c0_29] : memref<9x1x8x512xf32, #tpu.memory_space<vmem>>, vector<1x1x8x512xf32>
      %65 = vector.shape_cast %64 : vector<1x1x8x512xf32> to vector<8x512xf32>
      %c3_30 = arith.constant 3 : index
      %66 = arith.index_cast %arg4 : i32 to index
      %c0_31 = arith.constant 0 : index
      %c0_32 = arith.constant 0 : index
      %67 = vector.load %arg2[%c3_30, %66, %c0_31, %c0_32] : memref<9x1x8x512xf32, #tpu.memory_space<vmem>>, vector<1x1x8x512xf32>
      %68 = vector.shape_cast %67 : vector<1x1x8x512xf32> to vector<8x512xf32>
      %cst_33 = arith.constant 0.118318014 : f32
      %69 = vector.broadcast %cst_33 : f32 to vector<8x512xf32>
      %70 = arith.mulf %69, %65 : vector<8x512xf32>
      %cst_34 = arith.constant 0.118318014 : f32
      %71 = vector.broadcast %cst_34 : f32 to vector<8x512xf32>
      %72 = arith.mulf %71, %68 : vector<8x512xf32>
      %73 = arith.addf %55, %70 : vector<8x512xf32>
      %74 = arith.addf %56, %72 : vector<8x512xf32>
      %75 = arith.mulf %70, %65 : vector<8x512xf32>
      %76 = arith.addf %58, %75 : vector<8x512xf32>
      %77 = arith.mulf %72, %68 : vector<8x512xf32>
      %78 = arith.addf %60, %77 : vector<8x512xf32>
      %79 = arith.mulf %70, %68 : vector<8x512xf32>
      %80 = arith.addf %62, %79 : vector<8x512xf32>
      %c4 = arith.constant 4 : index
      %81 = arith.index_cast %arg4 : i32 to index
      %c0_35 = arith.constant 0 : index
      %c0_36 = arith.constant 0 : index
      %82 = vector.load %arg1[%c4, %81, %c0_35, %c0_36] : memref<9x1x8x512xf32, #tpu.memory_space<vmem>>, vector<1x1x8x512xf32>
      %83 = vector.shape_cast %82 : vector<1x1x8x512xf32> to vector<8x512xf32>
      %c4_37 = arith.constant 4 : index
      %84 = arith.index_cast %arg4 : i32 to index
      %c0_38 = arith.constant 0 : index
      %c0_39 = arith.constant 0 : index
      %85 = vector.load %arg2[%c4_37, %84, %c0_38, %c0_39] : memref<9x1x8x512xf32, #tpu.memory_space<vmem>>, vector<1x1x8x512xf32>
      %86 = vector.shape_cast %85 : vector<1x1x8x512xf32> to vector<8x512xf32>
      %cst_40 = arith.constant 0.147761315 : f32
      %87 = vector.broadcast %cst_40 : f32 to vector<8x512xf32>
      %88 = arith.mulf %87, %83 : vector<8x512xf32>
      %cst_41 = arith.constant 0.147761315 : f32
      %89 = vector.broadcast %cst_41 : f32 to vector<8x512xf32>
      %90 = arith.mulf %89, %86 : vector<8x512xf32>
      %91 = arith.addf %73, %88 : vector<8x512xf32>
      %92 = arith.addf %74, %90 : vector<8x512xf32>
      %93 = arith.mulf %88, %83 : vector<8x512xf32>
      %94 = arith.addf %76, %93 : vector<8x512xf32>
      %95 = arith.mulf %90, %86 : vector<8x512xf32>
      %96 = arith.addf %78, %95 : vector<8x512xf32>
      %97 = arith.mulf %88, %86 : vector<8x512xf32>
      %98 = arith.addf %80, %97 : vector<8x512xf32>
      %c5 = arith.constant 5 : index
      %99 = arith.index_cast %arg4 : i32 to index
      %c0_42 = arith.constant 0 : index
      %c0_43 = arith.constant 0 : index
      %100 = vector.load %arg1[%c5, %99, %c0_42, %c0_43] : memref<9x1x8x512xf32, #tpu.memory_space<vmem>>, vector<1x1x8x512xf32>
      %101 = vector.shape_cast %100 : vector<1x1x8x512xf32> to vector<8x512xf32>
      %c5_44 = arith.constant 5 : index
      %102 = arith.index_cast %arg4 : i32 to index
      %c0_45 = arith.constant 0 : index
      %c0_46 = arith.constant 0 : index
      %103 = vector.load %arg2[%c5_44, %102, %c0_45, %c0_46] : memref<9x1x8x512xf32, #tpu.memory_space<vmem>>, vector<1x1x8x512xf32>
      %104 = vector.shape_cast %103 : vector<1x1x8x512xf32> to vector<8x512xf32>
      %cst_47 = arith.constant 0.118318014 : f32
      %105 = vector.broadcast %cst_47 : f32 to vector<8x512xf32>
      %106 = arith.mulf %105, %101 : vector<8x512xf32>
      %cst_48 = arith.constant 0.118318014 : f32
      %107 = vector.broadcast %cst_48 : f32 to vector<8x512xf32>
      %108 = arith.mulf %107, %104 : vector<8x512xf32>
      %109 = arith.addf %91, %106 : vector<8x512xf32>
      %110 = arith.addf %92, %108 : vector<8x512xf32>
      %111 = arith.mulf %106, %101 : vector<8x512xf32>
      %112 = arith.addf %94, %111 : vector<8x512xf32>
      %113 = arith.mulf %108, %104 : vector<8x512xf32>
      %114 = arith.addf %96, %113 : vector<8x512xf32>
      %115 = arith.mulf %106, %104 : vector<8x512xf32>
      %116 = arith.addf %98, %115 : vector<8x512xf32>
      %c6 = arith.constant 6 : index
      %117 = arith.index_cast %arg4 : i32 to index
      %c0_49 = arith.constant 0 : index
      %c0_50 = arith.constant 0 : index
      %118 = vector.load %arg1[%c6, %117, %c0_49, %c0_50] : memref<9x1x8x512xf32, #tpu.memory_space<vmem>>, vector<1x1x8x512xf32>
      %119 = vector.shape_cast %118 : vector<1x1x8x512xf32> to vector<8x512xf32>
      %c6_51 = arith.constant 6 : index
      %120 = arith.index_cast %arg4 : i32 to index
      %c0_52 = arith.constant 0 : index
      %c0_53 = arith.constant 0 : index
      %121 = vector.load %arg2[%c6_51, %120, %c0_52, %c0_53] : memref<9x1x8x512xf32, #tpu.memory_space<vmem>>, vector<1x1x8x512xf32>
      %122 = vector.shape_cast %121 : vector<1x1x8x512xf32> to vector<8x512xf32>
      %cst_54 = arith.constant 0.0947416574 : f32
      %123 = vector.broadcast %cst_54 : f32 to vector<8x512xf32>
      %124 = arith.mulf %123, %119 : vector<8x512xf32>
      %cst_55 = arith.constant 0.0947416574 : f32
      %125 = vector.broadcast %cst_55 : f32 to vector<8x512xf32>
      %126 = arith.mulf %125, %122 : vector<8x512xf32>
      %127 = arith.addf %109, %124 : vector<8x512xf32>
      %128 = arith.addf %110, %126 : vector<8x512xf32>
      %129 = arith.mulf %124, %119 : vector<8x512xf32>
      %130 = arith.addf %112, %129 : vector<8x512xf32>
      %131 = arith.mulf %126, %122 : vector<8x512xf32>
      %132 = arith.addf %114, %131 : vector<8x512xf32>
      %133 = arith.mulf %124, %122 : vector<8x512xf32>
      %134 = arith.addf %116, %133 : vector<8x512xf32>
      %c7 = arith.constant 7 : index
      %135 = arith.index_cast %arg4 : i32 to index
      %c0_56 = arith.constant 0 : index
      %c0_57 = arith.constant 0 : index
      %136 = vector.load %arg1[%c7, %135, %c0_56, %c0_57] : memref<9x1x8x512xf32, #tpu.memory_space<vmem>>, vector<1x1x8x512xf32>
      %137 = vector.shape_cast %136 : vector<1x1x8x512xf32> to vector<8x512xf32>
      %c7_58 = arith.constant 7 : index
      %138 = arith.index_cast %arg4 : i32 to index
      %c0_59 = arith.constant 0 : index
      %c0_60 = arith.constant 0 : index
      %139 = vector.load %arg2[%c7_58, %138, %c0_59, %c0_60] : memref<9x1x8x512xf32, #tpu.memory_space<vmem>>, vector<1x1x8x512xf32>
      %140 = vector.shape_cast %139 : vector<1x1x8x512xf32> to vector<8x512xf32>
      %cst_61 = arith.constant 0.118318014 : f32
      %141 = vector.broadcast %cst_61 : f32 to vector<8x512xf32>
      %142 = arith.mulf %141, %137 : vector<8x512xf32>
      %cst_62 = arith.constant 0.118318014 : f32
      %143 = vector.broadcast %cst_62 : f32 to vector<8x512xf32>
      %144 = arith.mulf %143, %140 : vector<8x512xf32>
      %145 = arith.addf %127, %142 : vector<8x512xf32>
      %146 = arith.addf %128, %144 : vector<8x512xf32>
      %147 = arith.mulf %142, %137 : vector<8x512xf32>
      %148 = arith.addf %130, %147 : vector<8x512xf32>
      %149 = arith.mulf %144, %140 : vector<8x512xf32>
      %150 = arith.addf %132, %149 : vector<8x512xf32>
      %151 = arith.mulf %142, %140 : vector<8x512xf32>
      %152 = arith.addf %134, %151 : vector<8x512xf32>
      %c8 = arith.constant 8 : index
      %153 = arith.index_cast %arg4 : i32 to index
      %c0_63 = arith.constant 0 : index
      %c0_64 = arith.constant 0 : index
      %154 = vector.load %arg1[%c8, %153, %c0_63, %c0_64] : memref<9x1x8x512xf32, #tpu.memory_space<vmem>>, vector<1x1x8x512xf32>
      %155 = vector.shape_cast %154 : vector<1x1x8x512xf32> to vector<8x512xf32>
      %c8_65 = arith.constant 8 : index
      %156 = arith.index_cast %arg4 : i32 to index
      %c0_66 = arith.constant 0 : index
      %c0_67 = arith.constant 0 : index
      %157 = vector.load %arg2[%c8_65, %156, %c0_66, %c0_67] : memref<9x1x8x512xf32, #tpu.memory_space<vmem>>, vector<1x1x8x512xf32>
      %158 = vector.shape_cast %157 : vector<1x1x8x512xf32> to vector<8x512xf32>
      %cst_68 = arith.constant 0.0947416574 : f32
      %159 = vector.broadcast %cst_68 : f32 to vector<8x512xf32>
      %160 = arith.mulf %159, %155 : vector<8x512xf32>
      %cst_69 = arith.constant 0.0947416574 : f32
      %161 = vector.broadcast %cst_69 : f32 to vector<8x512xf32>
      %162 = arith.mulf %161, %158 : vector<8x512xf32>
      %163 = arith.addf %145, %160 : vector<8x512xf32>
      %164 = arith.addf %146, %162 : vector<8x512xf32>
      %165 = arith.mulf %160, %155 : vector<8x512xf32>
      %166 = arith.addf %148, %165 : vector<8x512xf32>
      %167 = arith.mulf %162, %158 : vector<8x512xf32>
      %168 = arith.addf %150, %167 : vector<8x512xf32>
      %169 = arith.mulf %160, %158 : vector<8x512xf32>
      %170 = arith.addf %152, %169 : vector<8x512xf32>
      %171 = arith.mulf %163, %163 : vector<8x512xf32>
      %172 = arith.mulf %164, %164 : vector<8x512xf32>
      %173 = arith.mulf %163, %164 : vector<8x512xf32>
      %174 = arith.subf %166, %171 : vector<8x512xf32>
      %175 = arith.subf %168, %172 : vector<8x512xf32>
      %176 = arith.subf %170, %173 : vector<8x512xf32>
      %cst_70 = arith.constant 2.000000e+00 : f32
      %177 = vector.broadcast %cst_70 : f32 to vector<8x512xf32>
      %178 = arith.mulf %177, %173 : vector<8x512xf32>
      %cst_71 = arith.constant 9.99999974E-5 : f32
      %179 = vector.broadcast %cst_71 : f32 to vector<8x512xf32>
      %180 = arith.addf %178, %179 : vector<8x512xf32>
      %cst_72 = arith.constant 2.000000e+00 : f32
      %181 = vector.broadcast %cst_72 : f32 to vector<8x512xf32>
      %182 = arith.mulf %181, %176 : vector<8x512xf32>
      %cst_73 = arith.constant 8.99999984E-4 : f32
      %183 = vector.broadcast %cst_73 : f32 to vector<8x512xf32>
      %184 = arith.addf %182, %183 : vector<8x512xf32>
      %185 = arith.mulf %180, %184 : vector<8x512xf32>
      %186 = arith.addf %171, %172 : vector<8x512xf32>
      %cst_74 = arith.constant 9.99999974E-5 : f32
      %187 = vector.broadcast %cst_74 : f32 to vector<8x512xf32>
      %188 = arith.addf %186, %187 : vector<8x512xf32>
      %189 = arith.addf %174, %175 : vector<8x512xf32>
      %cst_75 = arith.constant 8.99999984E-4 : f32
      %190 = vector.broadcast %cst_75 : f32 to vector<8x512xf32>
      %191 = arith.addf %189, %190 : vector<8x512xf32>
      %192 = arith.mulf %188, %191 : vector<8x512xf32>
      %193 = tpu.reciprocal %192 : vector<8x512xf32> -> vector<8x512xf32>
      %194 = arith.mulf %185, %193 : vector<8x512xf32>
      %195 = vector.extract_strided_slice %194 {offsets = [0, 0], sizes = [8, 128], strides = [1, 1]} : vector<8x512xf32> to vector<8x128xf32>
      %196 = arith.addf %arg5, %195 : vector<8x128xf32>
      %197 = vector.extract_strided_slice %194 {offsets = [0, 128], sizes = [8, 128], strides = [1, 1]} : vector<8x512xf32> to vector<8x128xf32>
      %198 = arith.addf %196, %197 : vector<8x128xf32>
      %199 = vector.extract_strided_slice %194 {offsets = [0, 256], sizes = [8, 128], strides = [1, 1]} : vector<8x512xf32> to vector<8x128xf32>
      %200 = arith.addf %198, %199 : vector<8x128xf32>
      %201 = vector.extract_strided_slice %194 {offsets = [0, 384], sizes = [8, 128], strides = [1, 1]} : vector<8x512xf32> to vector<8x128xf32>
      %202 = arith.addf %200, %201 : vector<8x128xf32>
      scf.yield %202 : vector<8x128xf32>
    }
    %7 = vector.shape_cast %6 : vector<8x128xf32> to vector<1x8x128xf32>
    %cst_3 = arith.constant dense<0.000000e+00> : vector<1xf32>
    %8 = vector.multi_reduction <add>, %7, %cst_3 [1, 2] : vector<1x8x128xf32> to vector<1xf32>
    %9 = vector.shape_cast %8 : vector<1xf32> to vector<1x1x1xf32>
    %10 = vector.extract %9[0, 0, 0] : f32 from vector<1x1x1xf32>
    %11 = vector.broadcast %10 : f32 to vector<1x1xf32>
    %12 = vector.shape_cast %11 : vector<1x1xf32> to vector<1x1x1xf32>
    %c0 = arith.constant 0 : index
    %c0_4 = arith.constant 0 : index
    %c0_5 = arith.constant 0 : index
    %13 = vector.load %arg3[%c0, %c0_4, %c0_5] : memref<1x1x1xf32, #tpu.memory_space<vmem>>, vector<1x1x1xf32>
    tpu.vector_store %arg3[%c0, %c0_4, %c0_5], %12 {strides = array<i32>} : memref<1x1x1xf32, #tpu.memory_space<vmem>>, vector<1x1x1xf32>,
    return
  }
  func.func @transform_0(%arg0: i32) -> (i32, i32, i32, i32) {
    %c0_i32 = arith.constant 0 : i32
    %c0_i32_0 = arith.constant 0 : i32
    %c0_i32_1 = arith.constant 0 : i32
    %c0_i32_2 = arith.constant 0 : i32
    return %c0_i32, %arg0, %c0_i32_0, %c0_i32_1 : i32, i32, i32, i32
  }
  func.func @transform_1(%arg0: i32) -> (i32, i32, i32, i32) {
    %c0_i32 = arith.constant 0 : i32
    %c0_i32_0 = arith.constant 0 : i32
    %c0_i32_1 = arith.constant 0 : i32
    %c0_i32_2 = arith.constant 0 : i32
    return %c0_i32, %arg0, %c0_i32_0, %c0_i32_1 : i32, i32, i32, i32
  }
  func.func @transform_2(%arg0: i32) -> (i32, i32, i32) {
    %c0_i32 = arith.constant 0 : i32
    %c0_i32_0 = arith.constant 0 : i32
    %c0_i32_1 = arith.constant 0 : i32
    return %arg0, %c0_i32, %c0_i32_0 : i32, i32, i32
  }
}

</mosaic_0001>

<bundles_post_ra>
// kernel: ssim_pallas.1
= control target key start
LH: loop header
LB: loop body
LE: loop exit
PB: predicated region body
PF: predicated region fallthrough
CT: control target
= control target key end

     0   :  { %7 = vsyncpa [#allocation3], 0  ;;  %v855_v0 = vmov 0.0   ;;  %s857_s9 = smov 0   ;;  %s979_s0 = inlined_call_operand.vmem [shape: f32[9,1,8,512], index: 0, kind: input, shape index: {}]   ;;  %s980_s1 = inlined_call_operand.vmem [shape: f32[9,1,8,512], index: 1, kind: input, shape index: {}]   ;;  %s981_s2 = inlined_call_operand.hbm [shape: f32[1,1,1], index: 2, kind: output, shape index: {}]  }
   0x1 LB: > { %s756_s10 = sshll.u32 %s837_s9, 5  ;;  %s18_s9 = sadd.s32 1, %s837_s9   ;;  %s837_s9 = sphi %s857_s9, %s18_s9   ;;  %v833_v0 = vphi %v855_v0, %v982_v0  }
   0x2   : > { %s869_s13 = scalar_lea.vmem %s979_s0, %s756_s10  ;;  %s874_s16 = scalar_lea.vmem %s980_s1, %s756_s10 }
   0x3   : > { %v25_v1 = vld [vmem:[%s869_s13] sm:$0xff]  ;;  %v26_v2 = vld [vmem:[%s869_s13 + $0x8] sm:$0xff]  ;;  %v27_v3 = vld [vmem:[%s869_s13 + $0x10] sm:$0xff]  ;;  %p17_p0 = scmp.ge.s32.totalorder %s18_s9, 1 }
   0x4   : > { %v28_v4 = vld [vmem:[%s869_s13 + $0x18] sm:$0xff]  ;;  %v31_v5 = vld [vmem:[%s874_s16] sm:$0xff]  ;;  %v32_v6 = vld [vmem:[%s874_s16 + $0x8] sm:$0xff]  ;;  %v35_v9 = vmul.f32 0.09474166, %v25_v1  ;;  %s839_s17 = smov (%p17_p0), [#allocation2]  }
   0x5   : > { %v33_v7 = vld [vmem:[%s874_s16 + $0x10] sm:$0xff]  ;;  %v34_v8 = vld [vmem:[%s874_s16 + $0x18] sm:$0xff]  ;;  %v36_v10 = vmul.f32 0.09474166, %v26_v2  ;;  %v37_v11 = vmul.f32 0.09474166, %v27_v3 }
   0x6   : > { %v38_v12 = vmul.f32 0.09474166, %v28_v4  ;;  %v39_v13 = vmul.f32 0.09474166, %v31_v5  ;;  %v40_v14 = vmul.f32 0.09474166, %v32_v6  ;;  %v43_v22 = vmul.f32 %v35_v9, %v25_v1 }
   0x7   : > { %v41_v15 = vmul.f32 0.09474166, %v33_v7  ;;  %v662_v16 = vld [vmem:[%s869_s13 + $0x20] sm:$0xff]  ;;  %v663_v17 = vld [vmem:[%s869_s13 + $0x28] sm:$0xff]  ;;  %v664_v18 = vld [vmem:[%s869_s13 + $0x30] sm:$0xff]  ;;  %v44_v23 = vmul.f32 %v36_v10, %v26_v2  ;;  %v45_v24 = vmul.f32 %v37_v11, %v27_v3  ;;  %v51_v35 = vmul.f32 %v35_v9, %v31_v5  ;;  %s573_s18 = sshll.u32 (%p17_p0), %s839_s17, 4  ;;  %s574_s18 = int_to_ptr.vmem [resolvable:$true] %s573_s18 }
   0x8   : > { %v42_v19 = vmul.f32 0.09474166, %v34_v8  ;;  %v665_v20 = vld [vmem:[%s869_s13 + $0x38] sm:$0xff]  ;;  %v668_v21 = vld [vmem:[%s874_s16 + $0x20] sm:$0xff]  ;;  %v46_v25 = vmul.f32 %v38_v12, %v28_v4  ;;  %v669_v26 = vld [vmem:[%s874_s16 + $0x28] sm:$0xff]  ;;  %v47_v29 = vmul.f32 %v39_v13, %v31_v5  ;;  %v48_v33 = vmul.f32 %v40_v14, %v32_v6  ;;  %s801_s20 = scalar_lea.vmem (%p17_p0), %s574_s18, 16  ;;  %p806_p2 = scmp.lt.s32.totalorder (%p17_p0), %s574_s18, %s574_s18 }
   0x9   : > { %v670_v27 = vld [vmem:[%s874_s16 + $0x30] sm:$0xff]  ;;  %v671_v28 = vld [vmem:[%s874_s16 + $0x38] sm:$0xff]  ;;  %v68_v30 = vmul.f32 0.118318014, %v662_v16  ;;  %v69_v31 = vmul.f32 0.118318014, %v663_v17  ;;  %v49_v34 = vmul.f32 %v41_v15, %v33_v7  ;;  %v52_v38 = vmul.f32 %v36_v10, %v32_v6  ;;  %p802_p1 = scmp.ne.s32.totalorder (%p17_p0), %s574_s18, %s801_s20 }
   0xa   : > { %v70_v32 = vmul.f32 0.118318014, %v664_v18  ;;  %v71_v36 = vmul.f32 0.118318014, %v665_v20  ;;  %v50_v37 = vmul.f32 %v42_v19, %v34_v8  ;;  %v72_v39 = vmul.f32 0.118318014, %v668_v21 }
   0xb   : > { %v73_v40 = vmul.f32 0.118318014, %v669_v26  ;;  %v53_v41 = vmul.f32 %v37_v11, %v33_v7  ;;  %v54_v42 = vmul.f32 %v38_v12, %v34_v8  ;;  %v74_v43 = vmul.f32 0.118318014, %v670_v27  ;;  %v674_v61 = vld [vmem:[%s869_s13 + $0x40] sm:$0xff]  ;;  %v675_v62 = vld [vmem:[%s869_s13 + $0x48] sm:$0xff] }
   0xc   : > { %v75_v44 = vmul.f32 0.118318014, %v671_v28  ;;  %v76_v45 = vadd.f32 %v68_v30, %v35_v9  ;;  %v84_v46 = vmul.f32 %v662_v16, %v68_v30  ;;  %v85_v47 = vmul.f32 %v663_v17, %v69_v31  ;;  %v676_v4 = vld [vmem:[%s869_s13 + $0x50] sm:$0xff]  ;;  %v677_v5 = vld [vmem:[%s869_s13 + $0x58] sm:$0xff]  ;;  %s805_s21 = scalar_lea.vmem (%p17_p0), %s574_s18, 32 }
   0xd   : > { %v86_v48 = vmul.f32 %v664_v18, %v70_v32  ;;  %v77_v49 = vadd.f32 %v69_v31, %v36_v10  ;;  %v78_v50 = vadd.f32 %v70_v32, %v37_v11  ;;  %v79_v51 = vadd.f32 %v71_v36, %v38_v12  ;;  %v680_v10 = vld [vmem:[%s874_s16 + $0x40] sm:$0xff]  ;;  %v681_v11 = vld [vmem:[%s874_s16 + $0x48] sm:$0xff]  ;;  %v682_v12 = vld [vmem:[%s874_s16 + $0x50] sm:$0xff]  ;;  %p807_p3 = scmp.lt.s32.totalorder (%p17_p0), %s805_s21, %s801_s20 }
   0xe   : > { %v87_v52 = vmul.f32 %v665_v20, %v71_v36  ;;  %v80_v53 = vadd.f32 %v72_v39, %v39_v13  ;;  %v81_v54 = vadd.f32 %v73_v40, %v40_v14  ;;  %v92_v55 = vmul.f32 %v668_v21, %v72_v39 }
   0xf   : > { %v93_v56 = vmul.f32 %v669_v26, %v73_v40  ;;  %v82_v57 = vadd.f32 %v74_v43, %v41_v15  ;;  %v83_v58 = vadd.f32 %v75_v44, %v42_v19  ;;  %v94_v59 = vmul.f32 %v670_v27, %v74_v43  ;;  %v683_v15 = vld [vmem:[%s874_s16 + $0x58] sm:$0xff]  ;;  %p808_p4 = por (%p17_p0), %p807_p3, %p806_p2 }
  0x10   : > { %v95_v60 = vmul.f32 %v671_v28, %v75_v44  ;;  %v88_v63 = vadd.f32 %v84_v46, %v43_v22  ;;  %v89_v1 = vadd.f32 %v85_v47, %v44_v23  ;;  %v90_v2 = vadd.f32 %v86_v48, %v45_v24  ;;  %v686_v46 = vld [vmem:[%s869_s13 + $0x60] sm:$0xff]  ;;  %v687_v47 = vld [vmem:[%s869_s13 + $0x68] sm:$0xff]  ;;  %v688_v48 = vld [vmem:[%s869_s13 + $0x70] sm:$0xff] }
  0x11   : > { %v100_v3 = vmul.f32 %v668_v21, %v68_v30  ;;  %v91_v6 = vadd.f32 %v87_v52, %v46_v25  ;;  %v101_v7 = vmul.f32 %v669_v26, %v69_v31  ;;  %v102_v8 = vmul.f32 %v670_v27, %v70_v32  ;;  %p809_p5 = pnand (%p17_p0), %p808_p4, %p802_p1 }
  0x12   : > { %v103_v9 = vmul.f32 %v671_v28, %v71_v36  ;;  %v96_v13 = vadd.f32 %v92_v55, %v47_v29  ;;  %v97_v14 = vadd.f32 %v93_v56, %v48_v33  ;;  %v121_v16 = vmul.f32 0.09474166, %v674_v61  ;;  %v689_v55 = vld [vmem:[%s869_s13 + $0x78] sm:$0xff] }
  0x13   : > { %v122_v17 = vmul.f32 0.09474166, %v675_v62  ;;  %v98_v18 = vadd.f32 %v94_v59, %v49_v34  ;;  %v99_v19 = vadd.f32 %v95_v60, %v50_v37  ;;  %v123_v20 = vmul.f32 0.09474166, %v676_v4  ;;  %v694_v60 = vld [vmem:[%s874_s16 + $0x70] sm:$0xff] }
  0x14   : > { %v124_v22 = vmul.f32 0.09474166, %v677_v5  ;;  %v104_v23 = vadd.f32 %v100_v3, %v51_v35  ;;  %v125_v21 = vmul.f32 0.09474166, %v680_v10  ;;  %v126_v24 = vmul.f32 0.09474166, %v681_v11 }
  0x15   : > { %v127_v30 = vmul.f32 0.09474166, %v682_v12  ;;  %v105_v25 = vadd.f32 %v101_v7, %v52_v38  ;;  %v106_v26 = vadd.f32 %v102_v8, %v53_v41  ;;  %v107_v27 = vadd.f32 %v103_v9, %v54_v42 }
  0x16   : > { %v128_v28 = vmul.f32 0.09474166, %v683_v15  ;;  %v129_v31 = vadd.f32 %v121_v16, %v76_v45  ;;  %v130_v32 = vadd.f32 %v122_v17, %v77_v49  ;;  %v137_v29 = vmul.f32 %v674_v61, %v121_v16  ;;  %v695_v61 = vld [vmem:[%s874_s16 + $0x78] sm:$0xff] }
  0x17   : > { %v138_v33 = vmul.f32 %v675_v62, %v122_v17  ;;  %v131_v36 = vadd.f32 %v123_v20, %v78_v50  ;;  %v132_v34 = vadd.f32 %v124_v22, %v79_v51  ;;  %v139_v37 = vmul.f32 %v676_v4, %v123_v20 }
  0x18   : > { %v140_v39 = vmul.f32 %v677_v5, %v124_v22  ;;  %v133_v35 = vadd.f32 %v125_v21, %v80_v53  ;;  %v134_v40 = vadd.f32 %v126_v24, %v81_v54  ;;  %v135_v43 = vadd.f32 %v127_v30, %v82_v57  ;;  %v692_v53 = vld [vmem:[%s874_s16 + $0x60] sm:$0xff] }
  0x19   : > { %v145_v38 = vmul.f32 %v680_v10, %v125_v21  ;;  %v136_v41 = vadd.f32 %v128_v28, %v83_v58  ;;  %v146_v42 = vmul.f32 %v681_v11, %v126_v24  ;;  %v147_v44 = vmul.f32 %v682_v12, %v127_v30  ;;  %v693_v58 = vld [vmem:[%s874_s16 + $0x68] sm:$0xff] }
  0x1a   : > { %v148_v45 = vmul.f32 %v683_v15, %v128_v28  ;;  %v141_v49 = vadd.f32 %v137_v29, %v88_v63  ;;  %v142_v50 = vadd.f32 %v138_v33, %v89_v1  ;;  %v153_v51 = vmul.f32 %v680_v10, %v121_v16  ;;  %v698_v29 = vld [vmem:[%s869_s13 + $0x80] sm:$0xff]  ;;  %v699_v33 = vld [vmem:[%s869_s13 + $0x88] sm:$0xff] }
  0x1b   : > { %v154_v52 = vmul.f32 %v681_v11, %v122_v17  ;;  %v143_v56 = vadd.f32 %v139_v37, %v90_v2  ;;  %v144_v54 = vadd.f32 %v140_v39, %v91_v6  ;;  %v155_v57 = vmul.f32 %v682_v12, %v123_v20  ;;  %v700_v39 = vld [vmem:[%s869_s13 + $0x90] sm:$0xff] }
  0x1c   : > { %v156_v59 = vmul.f32 %v683_v15, %v124_v22  ;;  %v149_v62 = vadd.f32 %v145_v38, %v96_v13  ;;  %v174_v3 = vmul.f32 0.118318014, %v686_v46  ;;  %v175_v4 = vmul.f32 0.118318014, %v687_v47  ;;  %v701_v38 = vld [vmem:[%s869_s13 + $0x98] sm:$0xff] }
  0x1d   : > { %v176_v5 = vmul.f32 0.118318014, %v688_v48  ;;  %v150_v7 = vadd.f32 %v146_v42, %v97_v14  ;;  %v151_v8 = vadd.f32 %v147_v44, %v98_v18  ;;  %v152_v9 = vadd.f32 %v148_v45, %v99_v19  ;;  %v705_v45 = vld [vmem:[%s874_s16 + $0x88] sm:$0xff] }
  0x1e   : > { %v177_v63 = vmul.f32 0.118318014, %v689_v55  ;;  %v157_v1 = vadd.f32 %v153_v51, %v104_v23  ;;  %v158_v10 = vadd.f32 %v154_v52, %v105_v25  ;;  %v178_v11 = vmul.f32 0.118318014, %v692_v53 }
  0x1f   : > { %v179_v16 = vmul.f32 0.118318014, %v693_v58  ;;  %v159_v17 = vadd.f32 %v155_v57, %v106_v26  ;;  %v160_v2 = vadd.f32 %v156_v59, %v107_v27  ;;  %v180_v6 = vmul.f32 0.118318014, %v694_v60 }
  0x20   : > { %v181_v12 = vmul.f32 0.118318014, %v695_v61  ;;  %v182_v15 = vadd.f32 %v174_v3, %v129_v31  ;;  %v190_v20 = vmul.f32 %v686_v46, %v174_v3  ;;  %v191_v13 = vmul.f32 %v687_v47, %v175_v4 }
  0x21   : > { %v192_v22 = vmul.f32 %v688_v48, %v176_v5  ;;  %v183_v21 = vadd.f32 %v175_v4, %v130_v32  ;;  %v184_v24 = vadd.f32 %v176_v5, %v131_v36  ;;  %v185_v14 = vadd.f32 %v177_v63, %v132_v34  ;;  %v707_v48 = vld [vmem:[%s874_s16 + $0x98] sm:$0xff] }
  0x22   : > { %v193_v18 = vmul.f32 %v689_v55, %v177_v63  ;;  %v186_v19 = vadd.f32 %v178_v11, %v133_v35  ;;  %v187_v23 = vadd.f32 %v179_v16, %v134_v40  ;;  %v198_v30 = vmul.f32 %v692_v53, %v178_v11 }
  0x23   : > { %v199_v25 = vmul.f32 %v693_v58, %v179_v16  ;;  %v188_v26 = vadd.f32 %v180_v6, %v135_v43  ;;  %v189_v27 = vadd.f32 %v181_v12, %v136_v41  ;;  %v200_v28 = vmul.f32 %v694_v60, %v180_v6  ;;  %v704_v43 = vld [vmem:[%s874_s16 + $0x80] sm:$0xff]  ;;  %v706_v41 = vld [vmem:[%s874_s16 + $0x90] sm:$0xff] }
  0x24   : > { %v201_v31 = vmul.f32 %v695_v61, %v181_v12  ;;  %v194_v32 = vadd.f32 %v190_v20, %v141_v49  ;;  %v195_v36 = vadd.f32 %v191_v13, %v142_v50  ;;  %v196_v34 = vadd.f32 %v192_v22, %v143_v56  ;;  %v710_v20 = vld [vmem:[%s869_s13 + $0xa0] sm:$0xff]  ;;  %v711_v13 = vld [vmem:[%s869_s13 + $0xa8] sm:$0xff]  ;;  %v712_v22 = vld [vmem:[%s869_s13 + $0xb0] sm:$0xff] }
  0x25   : > { %v206_v37 = vmul.f32 %v692_v53, %v174_v3  ;;  %v197_v35 = vadd.f32 %v193_v18, %v144_v54  ;;  %v207_v40 = vmul.f32 %v693_v58, %v175_v4  ;;  %v208_v42 = vmul.f32 %v694_v60, %v176_v5 }
  0x26   : > { %v209_v44 = vmul.f32 %v695_v61, %v177_v63  ;;  %v202_v46 = vadd.f32 %v198_v30, %v149_v62  ;;  %v203_v47 = vadd.f32 %v199_v25, %v150_v7  ;;  %v227_v51 = vmul.f32 0.14776132, %v698_v29  ;;  %v713_v30 = vld [vmem:[%s869_s13 + $0xb8] sm:$0xff] }
  0x27   : > { %v228_v52 = vmul.f32 0.14776132, %v699_v33  ;;  %v204_v55 = vadd.f32 %v200_v28, %v151_v8  ;;  %v205_v57 = vadd.f32 %v201_v31, %v152_v9  ;;  %v229_v49 = vmul.f32 0.14776132, %v700_v39  ;;  %v718_v31 = vld [vmem:[%s874_s16 + $0xb0] sm:$0xff] }
  0x28   : > { %v230_v50 = vmul.f32 0.14776132, %v701_v38  ;;  %v210_v56 = vadd.f32 %v206_v37, %v157_v1  ;;  %v231_v53 = vmul.f32 0.14776132, %v704_v43  ;;  %v232_v59 = vmul.f32 0.14776132, %v705_v45 }
  0x29   : > { %v233_v3 = vmul.f32 0.14776132, %v706_v41  ;;  %v211_v54 = vadd.f32 %v207_v40, %v158_v10  ;;  %v212_v58 = vadd.f32 %v208_v42, %v159_v17  ;;  %v213_v60 = vadd.f32 %v209_v44, %v160_v2 }
  0x2a   : > { %v234_v61 = vmul.f32 0.14776132, %v707_v48  ;;  %v235_v4 = vadd.f32 %v227_v51, %v182_v15  ;;  %v236_v5 = vadd.f32 %v228_v52, %v183_v21  ;;  %v243_v62 = vmul.f32 %v698_v29, %v227_v51  ;;  %v719_v29 = vld [vmem:[%s874_s16 + $0xb8] sm:$0xff] }
  0x2b   : > { %v244_v7 = vmul.f32 %v699_v33, %v228_v52  ;;  %v237_v63 = vadd.f32 %v229_v49, %v184_v24  ;;  %v238_v8 = vadd.f32 %v230_v50, %v185_v14  ;;  %v245_v9 = vmul.f32 %v700_v39, %v229_v49 }
  0x2c   : > { %v246_v11 = vmul.f32 %v701_v38, %v230_v50  ;;  %v239_v1 = vadd.f32 %v231_v53, %v186_v19  ;;  %v240_v16 = vadd.f32 %v232_v59, %v187_v23  ;;  %v241_v6 = vadd.f32 %v233_v3, %v188_v26  ;;  %v716_v19 = vld [vmem:[%s874_s16 + $0xa0] sm:$0xff] }
  0x2d   : > { %v251_v10 = vmul.f32 %v704_v43, %v231_v53  ;;  %v242_v17 = vadd.f32 %v234_v61, %v189_v27  ;;  %v252_v2 = vmul.f32 %v705_v45, %v232_v59  ;;  %v253_v12 = vmul.f32 %v706_v41, %v233_v3  ;;  %v717_v27 = vld [vmem:[%s874_s16 + $0xa8] sm:$0xff] }
  0x2e   : > { %v254_v15 = vmul.f32 %v707_v48, %v234_v61  ;;  %v247_v21 = vadd.f32 %v243_v62, %v194_v32  ;;  %v248_v24 = vadd.f32 %v244_v7, %v195_v36  ;;  %v259_v14 = vmul.f32 %v704_v43, %v227_v51  ;;  %v722_v62 = vld [vmem:[%s869_s13 + $0xc0] sm:$0xff]  ;;  %v723_v7 = vld [vmem:[%s869_s13 + $0xc8] sm:$0xff] }
  0x2f   : > { %v260_v18 = vmul.f32 %v705_v45, %v228_v52  ;;  %v249_v25 = vadd.f32 %v245_v9, %v196_v34  ;;  %v250_v23 = vadd.f32 %v246_v11, %v197_v35  ;;  %v261_v26 = vmul.f32 %v706_v41, %v229_v49  ;;  %v724_v11 = vld [vmem:[%s869_s13 + $0xd0] sm:$0xff] }
  0x30   : > { %v262_v28 = vmul.f32 %v707_v48, %v230_v50  ;;  %v255_v33 = vadd.f32 %v251_v10, %v202_v46  ;;  %v280_v37 = vmul.f32 0.118318014, %v710_v20  ;;  %v281_v39 = vmul.f32 0.118318014, %v711_v13  ;;  %v725_v10 = vld [vmem:[%s869_s13 + $0xd8] sm:$0xff] }
  0x31   : > { %v282_v38 = vmul.f32 0.118318014, %v712_v22  ;;  %v256_v40 = vadd.f32 %v252_v2, %v203_v47  ;;  %v257_v42 = vadd.f32 %v253_v12, %v204_v55  ;;  %v258_v44 = vadd.f32 %v254_v15, %v205_v57  ;;  %v729_v15 = vld [vmem:[%s874_s16 + $0xc8] sm:$0xff] }
  0x32   : > { %v283_v32 = vmul.f32 0.118318014, %v713_v30  ;;  %v263_v36 = vadd.f32 %v259_v14, %v210_v56  ;;  %v264_v43 = vadd.f32 %v260_v18, %v211_v54  ;;  %v284_v45 = vmul.f32 0.118318014, %v716_v19 }
  0x33   : > { %v285_v51 = vmul.f32 0.118318014, %v717_v27  ;;  %v265_v52 = vadd.f32 %v261_v26, %v212_v58  ;;  %v266_v34 = vadd.f32 %v262_v28, %v213_v60  ;;  %v286_v35 = vmul.f32 0.118318014, %v718_v31 }
  0x34   : > { %v287_v41 = vmul.f32 0.118318014, %v719_v29  ;;  %v288_v48 = vadd.f32 %v280_v37, %v235_v4  ;;  %v296_v49 = vmul.f32 %v710_v20, %v280_v37  ;;  %v297_v46 = vmul.f32 %v711_v13, %v281_v39 }
  0x35   : > { %v298_v50 = vmul.f32 %v712_v22, %v282_v38  ;;  %v289_v53 = vadd.f32 %v281_v39, %v236_v5  ;;  %v290_v59 = vadd.f32 %v282_v38, %v237_v63  ;;  %v291_v47 = vadd.f32 %v283_v32, %v238_v8  ;;  %v731_v22 = vld [vmem:[%s874_s16 + $0xd8] sm:$0xff] }
  0x36   : > { %v299_v55 = vmul.f32 %v713_v30, %v283_v32  ;;  %v292_v57 = vadd.f32 %v284_v45, %v239_v1  ;;  %v293_v56 = vadd.f32 %v285_v51, %v240_v16  ;;  %v304_v3 = vmul.f32 %v716_v19, %v284_v45 }
  0x37   : > { %v305_v54 = vmul.f32 %v717_v27, %v285_v51  ;;  %v294_v58 = vadd.f32 %v286_v35, %v241_v6  ;;  %v295_v60 = vadd.f32 %v287_v41, %v242_v17  ;;  %v306_v61 = vmul.f32 %v718_v31, %v286_v35  ;;  %v728_v6 = vld [vmem:[%s874_s16 + $0xc0] sm:$0xff]  ;;  %v730_v17 = vld [vmem:[%s874_s16 + $0xd0] sm:$0xff] }
  0x38   : > { %v307_v4 = vmul.f32 %v719_v29, %v287_v41  ;;  %v300_v5 = vadd.f32 %v296_v49, %v247_v21  ;;  %v301_v63 = vadd.f32 %v297_v46, %v248_v24  ;;  %v302_v8 = vadd.f32 %v298_v50, %v249_v25  ;;  %v734_v49 = vld [vmem:[%s869_s13 + $0xe0] sm:$0xff]  ;;  %v735_v46 = vld [vmem:[%s869_s13 + $0xe8] sm:$0xff]  ;;  %v736_v50 = vld [vmem:[%s869_s13 + $0xf0] sm:$0xff] }
  0x39   : > { %v312_v9 = vmul.f32 %v716_v19, %v280_v37  ;;  %v303_v1 = vadd.f32 %v299_v55, %v250_v23  ;;  %v313_v16 = vmul.f32 %v717_v27, %v281_v39  ;;  %v314_v2 = vmul.f32 %v718_v31, %v282_v38 }
  0x3a   : > { %v315_v12 = vmul.f32 %v719_v29, %v283_v32  ;;  %v308_v20 = vadd.f32 %v304_v3, %v255_v33  ;;  %v309_v13 = vadd.f32 %v305_v54, %v256_v40  ;;  %v333_v14 = vmul.f32 0.09474166, %v722_v62  ;;  %v737_v3 = vld [vmem:[%s869_s13 + $0xf8] sm:$0xff] }
  0x3b   : > { %v334_v18 = vmul.f32 0.09474166, %v723_v7  ;;  %v310_v30 = vadd.f32 %v306_v61, %v257_v42  ;;  %v311_v26 = vadd.f32 %v307_v4, %v258_v44  ;;  %v335_v21 = vmul.f32 0.09474166, %v724_v11  ;;  %v742_v4 = vld [vmem:[%s874_s16 + $0xf0] sm:$0xff] }
  0x3c   : > { %v336_v24 = vmul.f32 0.09474166, %v725_v10  ;;  %v316_v25 = vadd.f32 %v312_v9, %v263_v36  ;;  %v337_v19 = vmul.f32 0.09474166, %v728_v6  ;;  %v338_v28 = vmul.f32 0.09474166, %v729_v15 }
  0x3d   : > { %v339_v37 = vmul.f32 0.09474166, %v730_v17  ;;  %v317_v23 = vadd.f32 %v313_v16, %v264_v43  ;;  %v318_v27 = vadd.f32 %v314_v2, %v265_v52  ;;  %v319_v31 = vadd.f32 %v315_v12, %v266_v34 }
  0x3e   : > { %v340_v29 = vmul.f32 0.09474166, %v731_v22  ;;  %v341_v39 = vadd.f32 %v333_v14, %v288_v48  ;;  %v342_v38 = vadd.f32 %v334_v18, %v289_v53  ;;  %v349_v33 = vmul.f32 %v722_v62, %v333_v14  ;;  %v743_v62 = vld [vmem:[%s874_s16 + $0xf8] sm:$0xff] }
  0x3f   : > { %v350_v40 = vmul.f32 %v723_v7, %v334_v18  ;;  %v343_v32 = vadd.f32 %v335_v21, %v290_v59  ;;  %v344_v42 = vadd.f32 %v336_v24, %v291_v47  ;;  %v351_v44 = vmul.f32 %v724_v11, %v335_v21 }
  0x40   : > { %v352_v45 = vmul.f32 %v725_v10, %v336_v24  ;;  %v345_v36 = vadd.f32 %v337_v19, %v292_v57  ;;  %v346_v51 = vadd.f32 %v338_v28, %v293_v56  ;;  %v347_v35 = vadd.f32 %v339_v37, %v294_v58  ;;  %v740_v57 = vld [vmem:[%s874_s16 + $0xe0] sm:$0xff] }
  0x41   : > { %v357_v43 = vmul.f32 %v728_v6, %v337_v19  ;;  %v348_v52 = vadd.f32 %v340_v29, %v295_v60  ;;  %v358_v34 = vmul.f32 %v729_v15, %v338_v28  ;;  %v359_v41 = vmul.f32 %v730_v17, %v339_v37  ;;  %v741_v60 = vld [vmem:[%s874_s16 + $0xe8] sm:$0xff]  ;;  %v746_v19 = vld [vmem:[%s869_s13 + $0x100] sm:$0xff] }
  0x42   : > { %v360_v48 = vmul.f32 %v731_v22, %v340_v29  ;;  %v353_v53 = vadd.f32 %v349_v33, %v300_v5  ;;  %v354_v59 = vadd.f32 %v350_v40, %v301_v63  ;;  %v365_v47 = vmul.f32 %v728_v6, %v333_v14  ;;  %v748_v29 = vld [vmem:[%s869_s13 + $0x110] sm:$0xff]  ;;  %v749_v33 = vld [vmem:[%s869_s13 + $0x118] sm:$0xff] }
  0x43   : > { %v366_v55 = vmul.f32 %v729_v15, %v334_v18  ;;  %v355_v54 = vadd.f32 %v351_v44, %v302_v8  ;;  %v356_v56 = vadd.f32 %v352_v45, %v303_v1  ;;  %v367_v58 = vmul.f32 %v730_v17, %v335_v21 }
  0x44   : > { %v368_v61 = vmul.f32 %v731_v22, %v336_v24  ;;  %v361_v7 = vadd.f32 %v357_v43, %v308_v20  ;;  %v386_v9 = vmul.f32 0.118318014, %v734_v49  ;;  %v387_v11 = vmul.f32 0.118318014, %v735_v46  ;;  %v753_v43 = vld [vmem:[%s874_s16 + $0x108] sm:$0xff] }
  0x45   : > { %v388_v10 = vmul.f32 0.118318014, %v736_v50  ;;  %v362_v16 = vadd.f32 %v358_v34, %v309_v13  ;;  %v363_v2 = vadd.f32 %v359_v41, %v310_v30  ;;  %v364_v12 = vadd.f32 %v360_v48, %v311_v26  ;;  %v955_v41 = vld [vmem:[%s874_s16 + $0x110] sm:$0xff] }
  0x46   : > { %v389_v5 = vmul.f32 0.118318014, %v737_v3  ;;  %v940_v63 = vadd.f32 %v365_v47, %v316_v25  ;;  %v942_v6 = vadd.f32 %v366_v55, %v317_v23  ;;  %v390_v8 = vmul.f32 0.118318014, %v740_v57 }
  0x47   : > { %v391_v1 = vmul.f32 0.118318014, %v741_v60  ;;  %v944_v15 = vadd.f32 %v367_v58, %v318_v27  ;;  %v946_v17 = vadd.f32 %v368_v61, %v319_v31  ;;  %v392_v20 = vmul.f32 0.118318014, %v742_v4  ;;  %v747_v31 = vld [vmem:[%s869_s13 + $0x108] sm:$0xff] }
  0x48   : > { %v393_v22 = vmul.f32 0.118318014, %v743_v62  ;;  %v394_v13 = vadd.f32 %v386_v9, %v341_v39  ;;  %v402_v14 = vmul.f32 %v734_v49, %v386_v9  ;;  %v403_v18 = vmul.f32 %v735_v46, %v387_v11 }
  0x49   : > { %v404_v30 = vmul.f32 %v736_v50, %v388_v10  ;;  %v395_v26 = vadd.f32 %v387_v11, %v342_v38  ;;  %v396_v21 = vadd.f32 %v388_v10, %v343_v32  ;;  %v397_v24 = vadd.f32 %v389_v5, %v344_v42  ;;  %v752_v38 = vld [vmem:[%s874_s16 + $0x100] sm:$0xff] }
  0x4a   : > { %v405_v25 = vmul.f32 %v737_v3, %v389_v5  ;;  %v398_v28 = vadd.f32 %v390_v8, %v345_v36  ;;  %v399_v37 = vadd.f32 %v391_v1, %v346_v51  ;;  %v410_v23 = vmul.f32 %v740_v57, %v390_v8  ;;  %v958_v36 = vld [vmem:[%s874_s16 + $0x118] sm:$0xff] }
  0x4b   : > { %v411_v27 = vmul.f32 %v741_v60, %v391_v1  ;;  %v400_v39 = vadd.f32 %v392_v20, %v347_v35  ;;  %v401_v40 = vadd.f32 %v393_v22, %v348_v52  ;;  %v412_v44 = vmul.f32 %v742_v4, %v392_v20 }
  0x4c   : > { %v413_v45 = vmul.f32 %v743_v62, %v393_v22  ;;  %v406_v32 = vadd.f32 %v402_v14, %v353_v53  ;;  %v407_v34 = vadd.f32 %v403_v18, %v354_v59  ;;  %v408_v42 = vadd.f32 %v404_v30, %v355_v54 }
  0x4d   : > { %v439_v51 = vmul.f32 0.09474166, %v746_v19  ;;  %v409_v48 = vadd.f32 %v405_v25, %v356_v56  ;;  %v440_v49 = vmul.f32 0.09474166, %v747_v31  ;;  %v441_v46 = vmul.f32 0.09474166, %v748_v29 }
  0x4e   : > { %v442_v50 = vmul.f32 0.09474166, %v749_v33  ;;  %v414_v47 = vadd.f32 %v410_v23, %v361_v7  ;;  %v415_v55 = vadd.f32 %v411_v27, %v362_v16  ;;  %v443_v35 = vmul.f32 0.09474166, %v752_v38 }
  0x4f   : > { %v444_v52 = vmul.f32 0.09474166, %v753_v43  ;;  %v416_v3 = vadd.f32 %v412_v44, %v363_v2  ;;  %v417_v58 = vadd.f32 %v413_v45, %v364_v12  ;;  %v418_v61 = vmul.f32 %v740_v57, %v386_v9 }
  0x50   : > { %v445_v53 = vmul.f32 0.09474166, %v955_v41  ;;  %v419_v59 = vmul.f32 %v741_v60, %v387_v11  ;;  %v420_v54 = vmul.f32 %v742_v4, %v388_v10  ;;  %v421_v8 = vmul.f32 %v743_v62, %v389_v5 }
  0x51   : > { %v446_v1 = vmul.f32 0.09474166, %v958_v36  ;;  %v455_v20 = vmul.f32 %v746_v19, %v439_v51  ;;  %v456_v22 = vmul.f32 %v747_v31, %v440_v49  ;;  %v457_v56 = vmul.f32 %v748_v29, %v441_v46 }
  0x52   : > { %v458_v14 = vmul.f32 %v749_v33, %v442_v50  ;;  %v447_v18 = vadd.f32 %v439_v51, %v394_v13  ;;  %v448_v30 = vadd.f32 %v440_v49, %v395_v26  ;;  %v463_v7 = vmul.f32 %v752_v38, %v443_v35 }
  0x53   : > { %v464_v16 = vmul.f32 %v753_v43, %v444_v52  ;;  %v449_v25 = vadd.f32 %v441_v46, %v396_v21  ;;  %v451_v23 = vadd.f32 %v443_v35, %v398_v28  ;;  %v452_v2 = vadd.f32 %v444_v52, %v399_v37 }
  0x54   : > { %v465_v57 = vmul.f32 %v955_v41, %v445_v53  ;;  %v450_v9 = vadd.f32 %v442_v50, %v397_v24  ;;  %v453_v12 = vadd.f32 %v445_v53, %v400_v39  ;;  %v454_v60 = vadd.f32 %v446_v1, %v401_v40 }
  0x55   : > { %v466_v4 = vmul.f32 %v958_v36, %v446_v1  ;;  %v459_v62 = vadd.f32 %v455_v20, %v406_v32  ;;  %v460_v11 = vadd.f32 %v456_v22, %v407_v34  ;;  %v461_v10 = vadd.f32 %v457_v56, %v408_v42 }
  0x56   : > { %v462_v5 = vadd.f32 %v458_v14, %v409_v48  ;;  %v467_v19 = vadd.f32 %v463_v7, %v414_v47  ;;  %v468_v27 = vadd.f32 %v464_v16, %v415_v55  ;;  %v479_v13 = vmul.f32 %v447_v18, %v447_v18 }
  0x57   : > { %v480_v26 = vmul.f32 %v448_v30, %v448_v30  ;;  %v469_v31 = vadd.f32 %v465_v57, %v416_v3  ;;  %v481_v29 = vmul.f32 %v449_v25, %v449_v25  ;;  %v483_v21 = vmul.f32 %v451_v23, %v451_v23 }
  0x58   : > { %v484_v28 = vmul.f32 %v452_v2, %v452_v2  ;;  %v470_v37 = vadd.f32 %v466_v4, %v417_v58  ;;  %v482_v33 = vmul.f32 %v450_v9, %v450_v9  ;;  %v485_v44 = vmul.f32 %v453_v12, %v453_v12 }
  0x59   : > { %v486_v24 = vmul.f32 %v454_v60, %v454_v60  ;;  %v422_v39 = vadd.f32 %v418_v61, %v940_v63  ;;  %v423_v40 = vadd.f32 %v419_v59, %v942_v6  ;;  %v424_v45 = vadd.f32 %v420_v54, %v944_v15 }
  0x5a   : > { %v425_v32 = vadd.f32 %v421_v8, %v946_v17  ;;  %v471_v34 = vmul.f32 %v752_v38, %v439_v51  ;;  %v472_v42 = vmul.f32 %v753_v43, %v440_v49  ;;  %v491_v48 = vsub.f32 %v459_v62, %v479_v13 }
  0x5b   : > { %v492_v47 = vsub.f32 %v460_v11, %v480_v26  ;;  %v493_v55 = vsub.f32 %v461_v10, %v481_v29  ;;  %v495_v35 = vsub.f32 %v467_v19, %v483_v21  ;;  %v496_v52 = vsub.f32 %v468_v27, %v484_v28 }
  0x5c   : > { %v523_v3 = vadd.f32 %v483_v21, %v479_v13  ;;  %v494_v58 = vsub.f32 %v462_v5, %v482_v33  ;;  %v497_v53 = vsub.f32 %v469_v31, %v485_v44  ;;  %v498_v1 = vsub.f32 %v470_v37, %v486_v24 }
  0x5d   : > { %v524_v20 = vadd.f32 %v484_v28, %v480_v26  ;;  %v473_v63 = vmul.f32 %v955_v41, %v441_v46  ;;  %v474_v6 = vmul.f32 %v958_v36, %v442_v50  ;;  %v525_v61 = vadd.f32 %v485_v44, %v481_v29 }
  0x5e   : > { %v526_v15 = vadd.f32 %v486_v24, %v482_v33  ;;  %v475_v59 = vadd.f32 %v471_v34, %v422_v39  ;;  %v476_v17 = vadd.f32 %v472_v42, %v423_v40  ;;  %v487_v38 = vmul.f32 %v451_v23, %v447_v18 }
  0x5f   : > { %v488_v43 = vmul.f32 %v452_v2, %v448_v30  ;;  %v527_v51 = vadd.f32 0.0001, %v523_v3  ;;  %v528_v49 = vadd.f32 0.0001, %v524_v20  ;;  %v531_v54 = vadd.f32 %v495_v35, %v491_v48 }
  0x60   : > { %v532_v8 = vadd.f32 %v496_v52, %v492_v47  ;;  %v529_v22 = vadd.f32 0.0001, %v525_v61  ;;  %v530_v56 = vadd.f32 0.0001, %v526_v15  ;;  %v533_v14 = vadd.f32 %v497_v53, %v493_v55 }
  0x61   : > { %v534_v7 = vadd.f32 %v498_v1, %v494_v58  ;;  %v477_v16 = vadd.f32 %v473_v63, %v424_v45  ;;  %v489_v57 = vmul.f32 %v453_v12, %v449_v25  ;;  %v535_v4 = vadd.f32 0.0009, %v531_v54 }
  0x62   : > { %v536_v41 = vadd.f32 0.0009, %v532_v8  ;;  %v478_v46 = vadd.f32 %v474_v6, %v425_v32  ;;  %v537_v36 = vadd.f32 0.0009, %v533_v14  ;;  %v490_v62 = vmul.f32 %v454_v60, %v450_v9 }
  0x63   : > { %v538_v50 = vadd.f32 0.0009, %v534_v7  ;;  %v499_v11 = vsub.f32 %v475_v59, %v487_v38  ;;  %v539_v10 = vmul.f32 %v535_v4, %v527_v51  ;;  %v500_v30 = vsub.f32 %v476_v17, %v488_v43 }
  0x64   : > { %v540_v18 = vmul.f32 %v536_v41, %v528_v49  ;;  %v541_v23 = vmul.f32 %v537_v36, %v529_v22  ;;  %v501_v5 = vsub.f32 %v477_v16, %v489_v57  ;;  %v502_v19 = vsub.f32 %v478_v46, %v490_v62 }
  0x65   : > { %v542_v2 = vmul.f32 %v538_v50, %v530_v56  ;;  %793 = vrcp.f32 %v539_v10  ;;  %v503_v27 = vmul.f32 2.0, %v487_v38  ;;  %v511_v13 = vmul.f32 2.0, %v499_v11 }
  0x66   : > { %795 = vrcp.f32 %v540_v18  ;;  %v504_v25 = vmul.f32 2.0, %v488_v43  ;;  %v512_v12 = vmul.f32 2.0, %v500_v30  ;;  %v505_v26 = vmul.f32 2.0, %v489_v57 }
  0x67   : > { %797 = vrcp.f32 %v541_v23  ;;  %v513_v31 = vmul.f32 2.0, %v501_v5  ;;  %v506_v29 = vmul.f32 2.0, %v490_v62  ;;  %v507_v9 = vadd.f32 0.0001, %v503_v27 }
  0x68   : > { %799 = vrcp.f32 %v542_v2  ;;  %v514_v60 = vmul.f32 2.0, %v502_v19  ;;  %v515_v21 = vadd.f32 0.0009, %v511_v13  ;;  %v508_v28 = vadd.f32 0.0001, %v504_v25 }
  0x69   : > { %v516_v37 = vadd.f32 0.0009, %v512_v12  ;;  %v509_v33 = vadd.f32 0.0001, %v505_v26  ;;  %v517_v44 = vadd.f32 0.0009, %v513_v31 }
  0x6a   : > { %v510_v24 = vadd.f32 0.0001, %v506_v29  ;;  %v518_v39 = vadd.f32 0.0009, %v514_v60  ;;  %v519_v40 = vmul.f32 %v515_v21, %v507_v9  ;;  %vm565_vm0 = vcmask (%p17_p0), 0  }
  0x6b   : > { %v520_v45 = vmul.f32 %v516_v37, %v508_v28  ;;  %v521_v32 = vmul.f32 %v517_v44, %v509_v33 }
  0x6c   : > { %v522_v48 = vmul.f32 %v518_v39, %v510_v24 }
  0x72   : > { %v794_v34 = vpop.eup %793 }
  0x73   : > { %v796_v42 = vpop.eup %795  ;;  %v547_v47 = vmul.f32 %v794_v34, %v519_v40 }
  0x74   : > { %v798_v55 = vpop.eup %797  ;;  %v548_v35 = vmul.f32 %v796_v42, %v520_v45 }
  0x75   : > { %v800_v52 = vpop.eup %799  ;;  %v549_v3 = vmul.f32 %v798_v55, %v521_v32  ;;  %v551_v58 = vadd.f32 %v833_v0, %v547_v47 }
  0x76   : > { %v550_v53 = vmul.f32 %v800_v52, %v522_v48 }
  0x77   : > { %v552_v1 = vadd.f32 %v551_v58, %v548_v35 }
  0x79   : > { %v553_v20 = vadd.f32 %v552_v1, %v549_v3  ;;  %20 = sbr.rel (!%p17_p0) target bundleno = 1 (0x1), region = 53 }
  0x7b   : > { %v554_v63 = vadd.f32 %v553_v20, %v550_v53  }
  0x7d   : > { %v982_v0 = vmov %v554_v63  ;;  %555 = vadd.xlane.f32.xlu0 (%p17_p0), %v554_v63 }
 0x106   :  { %v556_v6 = vpop.xlane.xlu0 %555 }
 0x107   :  { %v557_v61 = vrot.slane %v556_v6, 4 }
 0x109   :  { %v558_v15 = vadd.f32 %v557_v61, %v556_v6 }
 0x10b   :  { %v559_v59 = vrot.slane %v558_v15, 2 }
 0x10d   :  { %v560_v17 = vadd.f32 %v559_v59, %v558_v15 }
 0x10f   :  { %v561_v38 = vrot.slane %v560_v17, 1 }
 0x111   :  { %v562_v0 = vadd.f32 %v561_v38, %v560_v17 }
 0x113   :  { %774 = vpush %v562_v0 }
 0x144   :  { %s775_s19 = spop %774 }
 0x145   :  { %v564_v43 = vstv %s775_s19 }
 0x146   :  { %566 = vst.msk [vmem:[#allocation2] sm:$0x1] %vm565_vm0, %v564_v43 }
 0x147   :  { %812 = shalt.err (!%p809_p5)
}
 0x148   :  { %576 = dma.vmem_to_hbm [thread:$0]  %s574_s18, 16, %s981_s2, [#allocation3]  }
 0x149   :  { %829 = dma.done.wait [#allocation3], 16  }
 0x14a   :  { %830 = vsyncadd [#allocation3], 4294967280 }
 0x14b   :  { %580 = vsyncpa [#allocation3], 1 }

</bundles_post_ra>
